<compile_context>
chip_gen: v6e
topology: v6e:2x2x1
jax: 0.10.0
libtpu: 0.0.40
codegen_flags: <defaults>
</compile_context>

<pallas_src>
import functools

import jax
import jax.numpy as jnp
from jax.experimental import pallas as pl
from jax.experimental.pallas import tpu as pltpu

LN_EPS = 1e-5   # PyTorch nn.LayerNorm default
LANE = 128      # TPU lane width
SLAB_ROWS = 8   # rows of the packed (bias, gamma, beta) parameter slab


def _round_up(x, m):
    return ((x + m - 1) // m) * m


def _cdiv(a, b):
    return -(-a // b)


def _sublane(dtype):
    return 8 if jnp.dtype(dtype).itemsize >= 4 else 16


def _pad2(a, rows, cols):
    r, c = a.shape
    return jnp.pad(a, ((0, rows - r), (0, cols - c)))


def _make_fused_mlp_kernel(hidden_true_dims, compute_dtype):
    """h = x; per hidden layer: relu(LN(h @ W + b) * g + beta); out = h @ Wf + bf."""
    nh = len(hidden_true_dims)

    def kernel(x_ref, *refs):
        o_ref = refs[-1]
        h = x_ref[...]
        for li in range(nh):
            w = refs[2 * li + 0][...]
            slab = refs[2 * li + 1][...].astype(jnp.float32)   # rows: 0=bias, 1=gamma, 2=beta
            if compute_dtype is not None:
                h = h.astype(compute_dtype)

            y = jnp.dot(h, w, preferred_element_type=jnp.float32) + slab[0:1, :]

            # LayerNorm over the TRUE width.  Padded lanes of y are exactly 0 (zero-padded
            # weight columns and bias), so full-width sum / sum-of-squares equal the
            # true-lane statistics; divide by the true width.
            inv_n = 1.0 / float(hidden_true_dims[li])
            s1 = jnp.sum(y, axis=-1, keepdims=True)
            s2 = jnp.sum(y * y, axis=-1, keepdims=True)
            mean = s1 * inv_n
            var = jnp.maximum(s2 * inv_n - mean * mean, 0.0)
            y = (y - mean) * jax.lax.rsqrt(var + LN_EPS)

            # gamma/beta are zero in padded lanes -> padded lanes come out exactly 0 again,
            # ReLU keeps them 0, and zero-padded next-layer W rows ignore them.
            h = jnp.maximum(y * slab[1:2, :] + slab[2:3, :], 0.0)
            # TODO(synk): training-mode dropout (stochastic masking via pltpu.prng_*) not
            # implemented; eval-mode dropout is identity.

        wf = refs[2 * nh + 0][...]
        bf = refs[2 * nh + 1][...].astype(jnp.float32)
        if compute_dtype is not None:
            h = h.astype(compute_dtype)
        o_ref[...] = (jnp.dot(h, wf, preferred_element_type=jnp.float32)
                      + bf).astype(o_ref.dtype)

    return kernel


def init_task_encoder_params(key, input_dim, hidden_dims, output_dim, dtype=jnp.float32):
    """Deterministic parameter init mirroring the module's layer shapes (unpadded)."""
    dims = [input_dim] + list(hidden_dims)
    params = {"hidden": [], "final": None}
    for i in range(len(dims) - 1):
        key, kw, kb = jax.random.split(key, 3)
        fan_in, fan_out = dims[i], dims[i + 1]
        bound = 1.0 / jnp.sqrt(fan_in)
        w = jax.random.uniform(kw, (fan_in, fan_out), dtype, -bound, bound)
        b = jax.random.uniform(kb, (1, fan_out), dtype, -bound, bound)
        gamma = jnp.ones((1, fan_out), dtype)   # nn.LayerNorm weight init
        beta = jnp.zeros((1, fan_out), dtype)   # nn.LayerNorm bias init
        params["hidden"].append((w, b, gamma, beta))
    key, kw, kb = jax.random.split(key, 3)
    fan_in = dims[-1]
    bound = 1.0 / jnp.sqrt(fan_in)
    w = jax.random.uniform(kw, (fan_in, output_dim), dtype, -bound, bound)
    b = jax.random.uniform(kb, (1, output_dim), dtype, -bound, bound)
    params["final"] = (w, b)
    return params


@functools.partial(jax.jit, static_argnames=("tm_req", "use_bf16_matmul"))
def task_encoder_forward(params, x, *, tm_req=512, use_bf16_matmul=False):
    """Forward pass of TaskEncoder (inference: dropout = identity). One fused pallas_call."""
    M, K = x.shape
    dtype = x.dtype
    itemsize = jnp.dtype(dtype).itemsize
    sub = _sublane(dtype)

    hidden = params["hidden"]
    wf, bf = params["final"]
    hidden_true = tuple(int(w.shape[1]) for (w, _, _, _) in hidden)
    out_true = int(wf.shape[1])

    # Only inter-layer hidden widths are padded to 128 lanes; K and out stay at true width
    # (their BlockSpec dims equal the full array dims, which is always legal).
    h_pad = tuple(_round_up(d, LANE) for d in hidden_true)
    w_dtype = jnp.bfloat16 if use_bf16_matmul else None

    # ---- Grid-invariant parameter operands (built first so we can size VMEM exactly). ----
    param_ops, param_specs = [], []
    for li, (w, b, g, be) in enumerate(hidden):
        d_in = K if li == 0 else h_pad[li - 1]
        d_out = h_pad[li]
        w_p = _pad2(w, d_in, d_out)
        if w_dtype is not None:
            w_p = w_p.astype(w_dtype)
        slab = jnp.concatenate(
            [_pad2(b, 1, d_out), _pad2(g, 1, d_out), _pad2(be, 1, d_out),
             jnp.zeros((SLAB_ROWS - 3, d_out), b.dtype)], axis=0)
        param_ops += [w_p, slab]
        param_specs += [pl.BlockSpec((d_in, d_out), lambda i: (0, 0)),
                        pl.BlockSpec((SLAB_ROWS, d_out), lambda i: (0, 0))]
    final_in = h_pad[-1] if hidden_true else K
    wf_p = _pad2(wf, final_in, out_true)
    if w_dtype is not None:
        wf_p = wf_p.astype(w_dtype)
    param_ops += [wf_p, bf]
    param_specs += [pl.BlockSpec((final_in, out_true), lambda i: (0, 0)),
                    pl.BlockSpec((1, out_true), lambda i: (0, 0))]
    param_bytes = sum(op.size * jnp.dtype(op.dtype).itemsize for op in param_ops)

    # ---- Generation-aware VMEM budget (v7x: 64 MiB/TC; v5e/v6e: 128 MiB). ----
    try:
        vmem_cap = int(pltpu.get_tpu_info().vmem_capacity_bytes)
    except Exception:
        vmem_cap = 64 * 1024 * 1024            # conservative fallback (v7x-sized)
    budget = min(vmem_cap * 3 // 4, 100 * 1024 * 1024)
    vmem_limit = min(vmem_cap * 7 // 8, 112 * 1024 * 1024)

    widest = max([K, out_true] + list(h_pad))

    def vmem_estimate(t):
        io = 2 * t * K * itemsize + 2 * t * out_true * itemsize   # double-buffered x / out blocks
        acts = 4 * (4 * t * widest)                               # ~4 live f32 activation slabs
        return io + 2 * param_bytes + acts                        # params conservatively 2-buffered

    # ---- Batch tiling: as deep as VMEM allows, balanced tiles, >=2 tiles for megacore. ----
    tm = max(sub, min(_round_up(tm_req, sub), _round_up(M, sub)))
    while tm > sub and vmem_estimate(tm) > budget:
        tm = max(sub, _round_up(tm // 2, sub))
    ntiles = _cdiv(M, tm)
    if ntiles < 2 and M >= 2 * sub:
        ntiles = 2                              # v7x has 2 TCs; cheap no-op cost on 1-TC chips
    tm = _round_up(_cdiv(M, ntiles), sub)       # balanced tiles: waste bounded by ~ntiles*sub rows
    grid = (ntiles,)

    # Batch is NOT padded: ragged boundary blocks are handled by Pallas (stores masked);
    # garbage boundary rows are row-independent through matmul/LN/ReLU and never written.
    operands = [x] + param_ops
    in_specs = [pl.BlockSpec((tm, K), lambda i: (i, 0))] + param_specs

    out = pl.pallas_call(
        _make_fused_mlp_kernel(hidden_true, w_dtype),
        out_shape=jax.ShapeDtypeStruct((M, out_true), dtype),
        grid_spec=pltpu.PrefetchScalarGridSpec(
            num_scalar_prefetch=0,
            grid=grid,
            in_specs=in_specs,
            out_specs=pl.BlockSpec((tm, out_true), lambda i: (i, 0)),
        ),
        compiler_params=pltpu.CompilerParams(
            dimension_semantics=("parallel",),   # megacore split of the batch axis on v7x
            vmem_limit_bytes=int(vmem_limit),
        ),
    )(*operands)
    return out


def _reference_forward(params, x):
    """Pure-JAX reference for a sanity check."""
    h = x.astype(jnp.float32)
    for (w, b, gamma, beta) in params["hidden"]:
        y = h @ w + b
        mean = jnp.mean(y, axis=-1, keepdims=True)
        var = jnp.mean((y - mean) ** 2, axis=-1, keepdims=True)
        y = (y - mean) * jax.lax.rsqrt(var + LN_EPS)
        h = jnp.maximum(y * gamma + beta, 0.0)
    w, b = params["final"]
    return h @ w + b


if __name__ == "__main__":
    key = jax.random.PRNGKey(0)
    k_params, k_x = jax.random.split(key)

    batch = 8
    input_dim = 32
    hidden_dims = [64, 64]
    output_dim = 16

    params = init_task_encoder_params(k_params, input_dim, hidden_dims, output_dim)
    x = jax.random.normal(k_x, (batch, input_dim), jnp.float32)

    out = jax.block_until_ready(task_encoder_forward(params, x))
    ref = _reference_forward(params, x)
    assert out.shape == (batch, output_dim)
    assert jnp.allclose(out, ref, atol=1e-3, rtol=1e-3), "mismatch vs reference"

    # Ragged batch (not a multiple of the tile / sublane): exercises boundary masking.
    x2 = jax.random.normal(jax.random.PRNGKey(1), (batch + 3, input_dim), jnp.float32)
    out2 = jax.block_until_ready(task_encoder_forward(params, x2))
    ref2 = _reference_forward(params, x2)
    assert out2.shape == (batch + 3, output_dim)
    assert jnp.allclose(out2, ref2, atol=1e-3, rtol=1e-3), "mismatch vs reference (ragged batch)"

    # Larger batch: balanced multi-tile grid (>=2 steps, v7x megacore path), still ragged.
    x3 = jax.random.normal(jax.random.PRNGKey(2), (300, input_dim), jnp.float32)
    out3 = jax.block_until_ready(task_encoder_forward(params, x3))
    ref3 = _reference_forward(params, x3)
    assert out3.shape == (300, output_dim)
    assert jnp.allclose(out3, ref3, atol=1e-3, rtol=1e-3), "mismatch vs reference (multi-tile)"

    # Optional bf16-MXU path (f32 accumulation + f32 LayerNorm) — looser tolerance.
    out_bf = jax.block_until_ready(task_encoder_forward(params, x, use_bf16_matmul=True))
    assert out_bf.shape == (batch, output_dim)
    assert jnp.allclose(out_bf, ref, atol=5e-2, rtol=5e-2), "mismatch vs reference (bf16 matmul)"

    print("KERNEL_OK")
</pallas_src>

<mosaic_0001>
module attributes {stable_mosaic.version = 11 : i64} {
  func.func @kernel(%arg0: i32, %arg1: memref<8x32xf32, #tpu.memory_space<vmem>>, %arg2: memref<32x128xf32, #tpu.memory_space<vmem>>, %arg3: memref<8x128xf32, #tpu.memory_space<vmem>>, %arg4: memref<128x128xf32, #tpu.memory_space<vmem>>, %arg5: memref<8x128xf32, #tpu.memory_space<vmem>>, %arg6: memref<128x16xf32, #tpu.memory_space<vmem>>, %arg7: memref<1x16xf32, #tpu.memory_space<vmem>>, %arg8: memref<8x16xf32, #tpu.memory_space<vmem>>) attributes {dimension_semantics = [#tpu.dimension_semantics<parallel>], iteration_bounds = array<i64: 1>, scalar_prefetch = 0 : i64, scratch_operands = 0 : i64, tpu.core_type = #tpu.core_type<tc>, window_params = [{transform_indices = @transform_0, window_bounds = array<i64: 8, 32>}, {pipeline_mode = #tpu.pipeline_mode<synchronous>, transform_indices = @transform_1, window_bounds = array<i64: 32, 128>}, {pipeline_mode = #tpu.pipeline_mode<synchronous>, transform_indices = @transform_2, window_bounds = array<i64: 8, 128>}, {pipeline_mode = #tpu.pipeline_mode<synchronous>, transform_indices = @transform_3, window_bounds = array<i64: 128, 128>}, {pipeline_mode = #tpu.pipeline_mode<synchronous>, transform_indices = @transform_4, window_bounds = array<i64: 8, 128>}, {pipeline_mode = #tpu.pipeline_mode<synchronous>, transform_indices = @transform_5, window_bounds = array<i64: 128, 16>}, {pipeline_mode = #tpu.pipeline_mode<synchronous>, transform_indices = @transform_6, window_bounds = array<i64: 1, 16>}, {transform_indices = @transform_7, window_bounds = array<i64: 8, 16>}]} {
    %c0 = arith.constant 0 : index
    %c0_0 = arith.constant 0 : index
    %0 = vector.load %arg1[%c0, %c0_0] : memref<8x32xf32, #tpu.memory_space<vmem>>, vector<8x32xf32>
    %c0_1 = arith.constant 0 : index
    %c0_2 = arith.constant 0 : index
    %1 = vector.load %arg2[%c0_1, %c0_2] : memref<32x128xf32, #tpu.memory_space<vmem>>, vector<32x128xf32>
    %c0_3 = arith.constant 0 : index
    %c0_4 = arith.constant 0 : index
    %2 = vector.load %arg3[%c0_3, %c0_4] : memref<8x128xf32, #tpu.memory_space<vmem>>, vector<8x128xf32>
    %cst = arith.constant dense<0.000000e+00> : vector<8x128xf32>
    %3 = tpu.matmul %0, %1, %cst {dimension_numbers = #tpu.dot_dimension_numbers<[1], [0], [0], [1], [0, 0, 1, 1], [], []>} : vector<8x32xf32>, vector<32x128xf32>, vector<8x128xf32> -> vector<8x128xf32>
    %4 = vector.extract_strided_slice %2 {offsets = [0, 0], sizes = [1, 128], strides = [1, 1]} : vector<8x128xf32> to vector<1x128xf32>
    %5 = vector.broadcast %4 : vector<1x128xf32> to vector<8x128xf32>
    %6 = arith.addf %3, %5 : vector<8x128xf32>
    %cst_5 = arith.constant dense<0.000000e+00> : vector<8xf32>
    %7 = vector.multi_reduction <add>, %6, %cst_5 [1] : vector<8x128xf32> to vector<8xf32>
    %8 = vector.shape_cast %7 : vector<8xf32> to vector<8x1xf32>
    %9 = arith.mulf %6, %6 : vector<8x128xf32>
    %cst_6 = arith.constant dense<0.000000e+00> : vector<8xf32>
    %10 = vector.multi_reduction <add>, %9, %cst_6 [1] : vector<8x128xf32> to vector<8xf32>
    %11 = vector.shape_cast %10 : vector<8xf32> to vector<8x1xf32>
    %cst_7 = arith.constant 1.562500e-02 : f32
    %12 = vector.broadcast %cst_7 : f32 to vector<8x1xf32>
    %13 = arith.mulf %8, %12 : vector<8x1xf32>
    %cst_8 = arith.constant 1.562500e-02 : f32
    %14 = vector.broadcast %cst_8 : f32 to vector<8x1xf32>
    %15 = arith.mulf %11, %14 : vector<8x1xf32>
    %16 = arith.mulf %13, %13 : vector<8x1xf32>
    %17 = arith.subf %15, %16 : vector<8x1xf32>
    %cst_9 = arith.constant 0.000000e+00 : f32
    %18 = vector.broadcast %cst_9 : f32 to vector<8x1xf32>
    %19 = arith.maximumf %17, %18 : vector<8x1xf32>
    %20 = vector.broadcast %13 : vector<8x1xf32> to vector<8x128xf32>
    %21 = arith.subf %6, %20 : vector<8x128xf32>
    %cst_10 = arith.constant 9.99999974E-6 : f32
    %22 = vector.broadcast %cst_10 : f32 to vector<8x1xf32>
    %23 = arith.addf %19, %22 : vector<8x1xf32>
    %24 = math.rsqrt %23 : vector<8x1xf32>
    %25 = vector.broadcast %24 : vector<8x1xf32> to vector<8x128xf32>
    %26 = arith.mulf %21, %25 : vector<8x128xf32>
    %27 = vector.extract_strided_slice %2 {offsets = [1, 0], sizes = [1, 128], strides = [1, 1]} : vector<8x128xf32> to vector<1x128xf32>
    %28 = vector.broadcast %27 : vector<1x128xf32> to vector<8x128xf32>
    %29 = arith.mulf %26, %28 : vector<8x128xf32>
    %30 = vector.extract_strided_slice %2 {offsets = [2, 0], sizes = [1, 128], strides = [1, 1]} : vector<8x128xf32> to vector<1x128xf32>
    %31 = vector.broadcast %30 : vector<1x128xf32> to vector<8x128xf32>
    %32 = arith.addf %29, %31 : vector<8x128xf32>
    %cst_11 = arith.constant 0.000000e+00 : f32
    %33 = vector.broadcast %cst_11 : f32 to vector<8x128xf32>
    %34 = arith.maximumf %32, %33 : vector<8x128xf32>
    %c0_12 = arith.constant 0 : index
    %c0_13 = arith.constant 0 : index
    %35 = vector.load %arg4[%c0_12, %c0_13] : memref<128x128xf32, #tpu.memory_space<vmem>>, vector<128x128xf32>
    %c0_14 = arith.constant 0 : index
    %c0_15 = arith.constant 0 : index
    %36 = vector.load %arg5[%c0_14, %c0_15] : memref<8x128xf32, #tpu.memory_space<vmem>>, vector<8x128xf32>
    %cst_16 = arith.constant dense<0.000000e+00> : vector<8x128xf32>
    %37 = tpu.matmul %34, %35, %cst_16 {dimension_numbers = #tpu.dot_dimension_numbers<[1], [0], [0], [1], [0, 0, 1, 1], [], []>} : vector<8x128xf32>, vector<128x128xf32>, vector<8x128xf32> -> vector<8x128xf32>
    %38 = vector.extract_strided_slice %36 {offsets = [0, 0], sizes = [1, 128], strides = [1, 1]} : vector<8x128xf32> to vector<1x128xf32>
    %39 = vector.broadcast %38 : vector<1x128xf32> to vector<8x128xf32>
    %40 = arith.addf %37, %39 : vector<8x128xf32>
    %cst_17 = arith.constant dense<0.000000e+00> : vector<8xf32>
    %41 = vector.multi_reduction <add>, %40, %cst_17 [1] : vector<8x128xf32> to vector<8xf32>
    %42 = vector.shape_cast %41 : vector<8xf32> to vector<8x1xf32>
    %43 = arith.mulf %40, %40 : vector<8x128xf32>
    %cst_18 = arith.constant dense<0.000000e+00> : vector<8xf32>
    %44 = vector.multi_reduction <add>, %43, %cst_18 [1] : vector<8x128xf32> to vector<8xf32>
    %45 = vector.shape_cast %44 : vector<8xf32> to vector<8x1xf32>
    %cst_19 = arith.constant 1.562500e-02 : f32
    %46 = vector.broadcast %cst_19 : f32 to vector<8x1xf32>
    %47 = arith.mulf %42, %46 : vector<8x1xf32>
    %cst_20 = arith.constant 1.562500e-02 : f32
    %48 = vector.broadcast %cst_20 : f32 to vector<8x1xf32>
    %49 = arith.mulf %45, %48 : vector<8x1xf32>
    %50 = arith.mulf %47, %47 : vector<8x1xf32>
    %51 = arith.subf %49, %50 : vector<8x1xf32>
    %cst_21 = arith.constant 0.000000e+00 : f32
    %52 = vector.broadcast %cst_21 : f32 to vector<8x1xf32>
    %53 = arith.maximumf %51, %52 : vector<8x1xf32>
    %54 = vector.broadcast %47 : vector<8x1xf32> to vector<8x128xf32>
    %55 = arith.subf %40, %54 : vector<8x128xf32>
    %cst_22 = arith.constant 9.99999974E-6 : f32
    %56 = vector.broadcast %cst_22 : f32 to vector<8x1xf32>
    %57 = arith.addf %53, %56 : vector<8x1xf32>
    %58 = math.rsqrt %57 : vector<8x1xf32>
    %59 = vector.broadcast %58 : vector<8x1xf32> to vector<8x128xf32>
    %60 = arith.mulf %55, %59 : vector<8x128xf32>
    %61 = vector.extract_strided_slice %36 {offsets = [1, 0], sizes = [1, 128], strides = [1, 1]} : vector<8x128xf32> to vector<1x128xf32>
    %62 = vector.broadcast %61 : vector<1x128xf32> to vector<8x128xf32>
    %63 = arith.mulf %60, %62 : vector<8x128xf32>
    %64 = vector.extract_strided_slice %36 {offsets = [2, 0], sizes = [1, 128], strides = [1, 1]} : vector<8x128xf32> to vector<1x128xf32>
    %65 = vector.broadcast %64 : vector<1x128xf32> to vector<8x128xf32>
    %66 = arith.addf %63, %65 : vector<8x128xf32>
    %cst_23 = arith.constant 0.000000e+00 : f32
    %67 = vector.broadcast %cst_23 : f32 to vector<8x128xf32>
    %68 = arith.maximumf %66, %67 : vector<8x128xf32>
    %c0_24 = arith.constant 0 : index
    %c0_25 = arith.constant 0 : index
    %69 = vector.load %arg6[%c0_24, %c0_25] : memref<128x16xf32, #tpu.memory_space<vmem>>, vector<128x16xf32>
    %c0_26 = arith.constant 0 : index
    %c0_27 = arith.constant 0 : index
    %70 = vector.load %arg7[%c0_26, %c0_27] : memref<1x16xf32, #tpu.memory_space<vmem>>, vector<1x16xf32>
    %cst_28 = arith.constant dense<0.000000e+00> : vector<8x16xf32>
    %71 = tpu.matmul %68, %69, %cst_28 {dimension_numbers = #tpu.dot_dimension_numbers<[1], [0], [0], [1], [0, 0, 1, 1], [], []>} : vector<8x128xf32>, vector<128x16xf32>, vector<8x16xf32> -> vector<8x16xf32>
    %72 = vector.broadcast %70 : vector<1x16xf32> to vector<8x16xf32>
    %73 = arith.addf %71, %72 : vector<8x16xf32>
    %c0_29 = arith.constant 0 : index
    %c0_30 = arith.constant 0 : index
    %74 = vector.load %arg8[%c0_29, %c0_30] : memref<8x16xf32, #tpu.memory_space<vmem>>, vector<8x16xf32>
    tpu.vector_store %arg8[%c0_29, %c0_30], %73 {strides = array<i32>} : memref<8x16xf32, #tpu.memory_space<vmem>>, vector<8x16xf32>,
    return
  }
  func.func @transform_0(%arg0: i32) -> (i32, i32) {
    %c0_i32 = arith.constant 0 : i32
    %c0_i32_0 = arith.constant 0 : i32
    return %arg0, %c0_i32 : i32, i32
  }
  func.func @transform_1(%arg0: i32) -> (i32, i32) {
    %c0_i32 = arith.constant 0 : i32
    %c0_i32_0 = arith.constant 0 : i32
    %c0_i32_1 = arith.constant 0 : i32
    return %c0_i32, %c0_i32_0 : i32, i32
  }
  func.func @transform_2(%arg0: i32) -> (i32, i32) {
    %c0_i32 = arith.constant 0 : i32
    %c0_i32_0 = arith.constant 0 : i32
    %c0_i32_1 = arith.constant 0 : i32
    return %c0_i32, %c0_i32_0 : i32, i32
  }
  func.func @transform_3(%arg0: i32) -> (i32, i32) {
    %c0_i32 = arith.constant 0 : i32
    %c0_i32_0 = arith.constant 0 : i32
    %c0_i32_1 = arith.constant 0 : i32
    return %c0_i32, %c0_i32_0 : i32, i32
  }
  func.func @transform_4(%arg0: i32) -> (i32, i32) {
    %c0_i32 = arith.constant 0 : i32
    %c0_i32_0 = arith.constant 0 : i32
    %c0_i32_1 = arith.constant 0 : i32
    return %c0_i32, %c0_i32_0 : i32, i32
  }
  func.func @transform_5(%arg0: i32) -> (i32, i32) {
    %c0_i32 = arith.constant 0 : i32
    %c0_i32_0 = arith.constant 0 : i32
    %c0_i32_1 = arith.constant 0 : i32
    return %c0_i32, %c0_i32_0 : i32, i32
  }
  func.func @transform_6(%arg0: i32) -> (i32, i32) {
    %c0_i32 = arith.constant 0 : i32
    %c0_i32_0 = arith.constant 0 : i32
    %c0_i32_1 = arith.constant 0 : i32
    return %c0_i32, %c0_i32_0 : i32, i32
  }
  func.func @transform_7(%arg0: i32) -> (i32, i32) {
    %c0_i32 = arith.constant 0 : i32
    %c0_i32_0 = arith.constant 0 : i32
    return %arg0, %c0_i32 : i32, i32
  }
}

</mosaic_0001>

<bundles_post_ra>
// kernel: task_encoder_forward.1
= control target key start
LH: loop header
LB: loop body
LE: loop exit
PB: predicated region body
PF: predicated region fallthrough
CT: control target
= control target key end

     0   :  { %v512_v1 = vmov 0.0   ;;  %vm513_vm0 = vmmov 0   ;;  %s759_s0 = inlined_call_operand.vmem [shape: f32[8,32], index: 0, kind: input, shape index: {}]   ;;  %s760_s1 = inlined_call_operand.vmem [shape: f32[32,128], index: 1, kind: input, shape index: {}]   ;;  %s761_s2 = inlined_call_operand.vmem [shape: f32[8,128], index: 2, kind: input, shape index: {}]   ;;  %s762_s3 = inlined_call_operand.vmem [shape: f32[128,128], index: 3, kind: input, shape index: {}]   ;;  %s763_s4 = inlined_call_operand.vmem [shape: f32[8,128], index: 4, kind: input, shape index: {}]   ;;  %s764_s5 = inlined_call_operand.vmem [shape: f32[128,16], index: 5, kind: input, shape index: {}]   ;;  %s765_s6 = inlined_call_operand.vmem [shape: f32[1,16], index: 6, kind: input, shape index: {}]   ;;  %s766_s7 = inlined_call_operand.hbm [shape: f32[8,16], index: 7, kind: output, shape index: {}]  }
   0x1   :  { %v31_v0 = vld [vmem:[%s760_s1 + $0x18] sm:$0xff]  ;;  %402 = vmatprep.subr.mxu0 %v512_v1  ;;  %v30_v2 = vld [vmem:[%s760_s1 + $0x10] sm:$0xff]  ;;  %410 = vmatprep.mubr.msk.f32.mxu0 %vm513_vm0, %v512_v1 }
   0x2   :  { %403 = vmatpush3.msra.mxu0 %v31_v0  ;;  %413 = vmatprep.subr.mxu1 %v512_v1 }
   0x3   :  { %12 = vsyncpa [#allocation3], 0  ;;  %404 = vmatprep.subr.mxu0 %v512_v1  ;;  %v29_v3 = vld [vmem:[%s760_s1 + $0x8] sm:$0xff]  ;;  %445 = vmatprep.mubr.msk.f32.mxu1 %vm513_vm0, %v512_v1  ;;  %v28_v4 = vld [vmem:[%s760_s1] sm:$0xff]  ;;  %vm37_vm1 = vcmask 261120   ;;  %v33_v6 = vlaneseq  ;;  %s514_s21 = smov [#allocation2]  }
   0x4   :  { %405 = vmatpush3.msra.mxu0 %v30_v2  ;;  %v27_v5 = vld [vmem:[%s759_s0] sm:$0xff]  ;;  %v151_v15 = vld [vmem:[%s762_s3 + $0x78] sm:$0xff]  ;;  %v150_v16 = vld [vmem:[%s762_s3 + $0x70] sm:$0xff]  ;;  %s353_s22 = sshll.u32 %s514_s21, 4  ;;  %vm345_vm2 = vcmask 130048   ;;  %s354_s22 = int_to_ptr.vmem [resolvable:$true] %s353_s22 }
   0x5   :  { %406 = vmatprep.subr.mxu0 %v512_v1  ;;  %v582_v7 = vshrl.u32 %v33_v6, 7  ;;  %v588_v9 = vld [vmem:[%s761_s2] sm:$0xff]  ;;  %414 = vmatpush3.msra.mxu1 %v151_v15  ;;  %v149_v17 = vld [vmem:[%s762_s3 + $0x68] sm:$0xff]  ;;  %v147_v19 = vld [vmem:[%s762_s3 + $0x58] sm:$0xff]  ;;  %s490_s23 = scalar_lea.vmem %s354_s22, 128  ;;  %p495_p1 = scmp.lt.s32.totalorder %s354_s22, %s354_s22 }
   0x6   :  { %407 = vmatpush3.msra.mxu0 %v29_v3  ;;  %415 = vmatprep.subr.mxu1 %v512_v1  ;;  %v148_v18 = vld [vmem:[%s762_s3 + $0x60] sm:$0xff]  ;;  %v146_v20 = vld [vmem:[%s762_s3 + $0x50] sm:$0xff]  ;;  %v145_v21 = vld [vmem:[%s762_s3 + $0x48] sm:$0xff]  ;;  %p491_p0 = scmp.ne.s32.totalorder %s354_s22, %s490_s23  ;;  %p496_p2 = scmp.lt.s32.totalorder %s490_s23, %s490_s23 }
   0x7   :  { %408 = vmatprep.subr.mxu0 %v512_v1  ;;  %v35_v8 = vsub.s32 0, %v582_v7  ;;  %416 = vmatpush3.msra.mxu1 %v150_v16  ;;  %v144_v22 = vld [vmem:[%s762_s3 + $0x40] sm:$0xff]  ;;  %v143_v23 = vld [vmem:[%s762_s3 + $0x38] sm:$0xff]  ;;  %v142_v24 = vld [vmem:[%s762_s3 + $0x30] sm:$0xff]  ;;  %v127_v39 = vsub.s32 1, %v582_v7  ;;  %v132_v40 = vsub.s32 2, %v582_v7 }
   0x8   :  { %409 = vmatpush3.msra.mxu0 %v28_v4  ;;  %417 = vmatprep.subr.mxu1 %v512_v1  ;;  %v141_v25 = vld [vmem:[%s762_s3 + $0x28] sm:$0xff]  ;;  %v140_v26 = vld [vmem:[%s762_s3 + $0x20] sm:$0xff]  ;;  %v139_v27 = vld [vmem:[%s762_s3 + $0x18] sm:$0xff]  ;;  %p497_p3 = por %p496_p2, %p495_p1 }
   0x9   :  { %411 = vmatmul.mubr.msk.f32.vlgmr.msra.gmra.mxu0 %vm37_vm1, %v27_v5  ;;  %448 = vmatprep.subr.mxu0 %v512_v1  ;;  %v36_v10 = vrot.slane %v588_v9, %v35_v8  ;;  %v138_v28 = vld [vmem:[%s762_s3 + $0x10] sm:$0xff]  ;;  %v137_v29 = vld [vmem:[%s762_s3 + $0x8] sm:$0xff]  ;;  %v136_v30 = vld [vmem:[%s762_s3] sm:$0xff]  ;;  %v128_v41 = vrot.slane %v588_v9, %v127_v39  ;;  %v133_v45 = vrot.slane %v588_v9, %v132_v40 }
   0xa   :  { %480 = vmatprep.mubr.msk.f32.mxu0 %vm513_vm0, %v512_v1  ;;  %418 = vmatpush3.msra.mxu1 %v149_v17  ;;  %v673_v49 = vld [vmem:[%s763_s4] sm:$0xff]  ;;  %v267_v55 = vld [vmem:[%s764_s5 + $0x78] sm:$0xff]  ;;  %v266_v56 = vld [vmem:[%s764_s5 + $0x70] sm:$0xff]  ;;  %p498_p4 = pnand %p497_p3, %p491_p0 }
   0xb   :  { %419 = vmatprep.subr.mxu1 %v512_v1  ;;  %v156_v50 = vrot.slane %v673_v49, %v35_v8  ;;  %449 = vmatpush3.msra.mxu0 %v267_v55  ;;  %v265_v57 = vld [vmem:[%s764_s5 + $0x68] sm:$0xff]  ;;  %v264_v58 = vld [vmem:[%s764_s5 + $0x60] sm:$0xff]  ;;  %v263_v59 = vld [vmem:[%s764_s5 + $0x58] sm:$0xff]  ;;  %v244_v17 = vrot.slane %v673_v49, %v127_v39 }
   0xc   :  { %420 = vmatpush3.msra.mxu1 %v148_v18  ;;  %450 = vmatprep.subr.mxu0 %v512_v1  ;;  %v262_v60 = vld [vmem:[%s764_s5 + $0x50] sm:$0xff]  ;;  %v261_v61 = vld [vmem:[%s764_s5 + $0x48] sm:$0xff]  ;;  %v260_v62 = vld [vmem:[%s764_s5 + $0x40] sm:$0xff] }
   0xd   :  { %421 = vmatprep.subr.mxu1 %v512_v1  ;;  %451 = vmatpush3.msra.mxu0 %v266_v56  ;;  %v259_v63 = vld [vmem:[%s764_s5 + $0x38] sm:$0xff]  ;;  %v258_v0 = vld [vmem:[%s764_s5 + $0x30] sm:$0xff]  ;;  %v257_v2 = vld [vmem:[%s764_s5 + $0x28] sm:$0xff] }
   0xe   :  { %422 = vmatpush3.msra.mxu1 %v147_v19  ;;  %452 = vmatprep.subr.mxu0 %v512_v1  ;;  %v256_v3 = vld [vmem:[%s764_s5 + $0x20] sm:$0xff]  ;;  %v255_v4 = vld [vmem:[%s764_s5 + $0x18] sm:$0xff]  ;;  %v254_v5 = vld [vmem:[%s764_s5 + $0x10] sm:$0xff] }
   0xf   :  { %423 = vmatprep.subr.mxu1 %v512_v1  ;;  %453 = vmatpush3.msra.mxu0 %v265_v57  ;;  %v253_v6 = vld [vmem:[%s764_s5 + $0x8] sm:$0xff]  ;;  %v252_v8 = vld [vmem:[%s764_s5] sm:$0xff] }
  0x10   :  { %424 = vmatpush3.msra.mxu1 %v146_v20  ;;  %454 = vmatprep.subr.mxu0 %v512_v1 }
  0x11   :  { %425 = vmatprep.subr.mxu1 %v512_v1  ;;  %455 = vmatpush3.msra.mxu0 %v264_v58 }
  0x12   :  { %426 = vmatpush3.msra.mxu1 %v145_v21  ;;  %456 = vmatprep.subr.mxu0 %v512_v1 }
  0x13   :  { %427 = vmatprep.subr.mxu1 %v512_v1  ;;  %457 = vmatpush3.msra.mxu0 %v263_v59 }
  0x14   :  { %428 = vmatpush3.msra.mxu1 %v144_v22  ;;  %458 = vmatprep.subr.mxu0 %v512_v1 }
  0x15   :  { %429 = vmatprep.subr.mxu1 %v512_v1  ;;  %459 = vmatpush3.msra.mxu0 %v262_v60 }
  0x16   :  { %430 = vmatpush3.msra.mxu1 %v143_v23  ;;  %460 = vmatprep.subr.mxu0 %v512_v1 }
  0x17   :  { %431 = vmatprep.subr.mxu1 %v512_v1  ;;  %461 = vmatpush3.msra.mxu0 %v261_v61 }
  0x18   :  { %432 = vmatpush3.msra.mxu1 %v142_v24  ;;  %462 = vmatprep.subr.mxu0 %v512_v1  ;;  %v362_v24 = vld [vmem:[%s765_s6] ss:$0 sm:$0xff] }
  0x19   :  { %433 = vmatprep.subr.mxu1 %v512_v1  ;;  %463 = vmatpush3.msra.mxu0 %v260_v62 }
  0x1a   :  { %434 = vmatpush3.msra.mxu1 %v141_v25  ;;  %464 = vmatprep.subr.mxu0 %v512_v1 }
  0x1b   :  { %435 = vmatprep.subr.mxu1 %v512_v1  ;;  %465 = vmatpush3.msra.mxu0 %v259_v63 }
  0x1c   :  { %436 = vmatpush3.msra.mxu1 %v140_v26  ;;  %466 = vmatprep.subr.mxu0 %v512_v1 }
  0x1d   :  { %437 = vmatprep.subr.mxu1 %v512_v1  ;;  %467 = vmatpush3.msra.mxu0 %v258_v0 }
  0x1e   :  { %438 = vmatpush3.msra.mxu1 %v139_v27  ;;  %468 = vmatprep.subr.mxu0 %v512_v1 }
  0x1f   :  { %439 = vmatprep.subr.mxu1 %v512_v1  ;;  %469 = vmatpush3.msra.mxu0 %v257_v2 }
  0x20   :  { %440 = vmatpush3.msra.mxu1 %v138_v28  ;;  %470 = vmatprep.subr.mxu0 %v512_v1 }
  0x21   :  { %441 = vmatprep.subr.mxu1 %v512_v1  ;;  %471 = vmatpush3.msra.mxu0 %v256_v3 }
  0x22   :  { %442 = vmatpush3.msra.mxu1 %v137_v29  ;;  %472 = vmatprep.subr.mxu0 %v512_v1 }
  0x23   :  { %443 = vmatprep.subr.mxu1 %v512_v1  ;;  %473 = vmatpush3.msra.mxu0 %v255_v4 }
  0x24   :  { %444 = vmatpush3.msra.mxu1 %v136_v30  ;;  %474 = vmatprep.subr.mxu0 %v512_v1 }
  0x25   :  { %475 = vmatpush3.msra.mxu0 %v254_v5 }
  0x26   :  { %476 = vmatprep.subr.mxu0 %v512_v1 }
  0x27   :  { %477 = vmatpush3.msra.mxu0 %v253_v6 }
  0x28   :  { %478 = vmatprep.subr.mxu0 %v512_v1  ;;  %v249_v1 = vrot.slane %v673_v49, %v132_v40 }
  0x29   :  { %479 = vmatpush3.msra.mxu0 %v252_v8 }
  0xc9   :  { %v107_v11 = vpop.f32.mrf.mxu0 }
  0xca   :  { %v593_v12 = vadd.f32 %v107_v11, %v36_v10 }
  0xcb   :  { %v412_v13 = vpop.f32.mrf.mxu0 }
  0xcc   :  { %111 = vadd.xlane.f32.xlu0 %v593_v12  ;;  %v113_v14 = vmul.f32 %v593_v12, %v593_v12 }
  0xd0   :  { %114 = vadd.xlane.f32.xlu0 %v113_v14 }
 0x155   :  { %v112_v31 = vpop.xlane.xlu0 %111 }
 0x156   :  { %v116_v32 = vmul.f32 0.015625, %v112_v31 }
 0x158   :  { %v118_v34 = vmul.f32 %v116_v32, %v116_v32  ;;  %v121_v42 = vsub.f32 %v593_v12, %v116_v32 }
 0x159   :  { %v115_v33 = vpop.xlane.xlu0 %114 }
 0x15a   :  { %v117_v35 = vmul.f32 0.015625, %v115_v33 }
 0x15c   :  { %v119_v36 = vsub.f32 %v117_v35, %v118_v34 }
 0x15e   :  { %v120_v37 = vmax.f32 %v119_v36, 0.0 }
 0x160   :  { %v122_v38 = vadd.f32 1e-05, %v120_v37 }
 0x162   :  { %486 = vrsqrt.f32 %v122_v38 }
 0x16f   :  { %v487_v43 = vpop.eup %486 }
 0x170   :  { %v124_v44 = vmul.f32 %v487_v43, %v121_v42 }
 0x172   :  { %v129_v46 = vmul.f32 %v128_v41, %v124_v44 }
 0x174   :  { %v134_v47 = vadd.f32 %v133_v45, %v129_v46 }
 0x176   :  { %v135_v48 = vmax.f32 %v134_v47, 0.0 }
 0x178   :  { %446 = vmatmul.mubr.f32.vlgmr.msra.gmra.mxu1 %v135_v48 }
 0x238   :  { %v223_v51 = vpop.f32.mrf.mxu1 }
 0x239   :  { %v678_v52 = vadd.f32 %v223_v51, %v156_v50 }
 0x23a   :  { %v447_v53 = vpop.f32.mrf.mxu1 }
 0x23b   :  { %227 = vadd.xlane.f32.xlu1 %v678_v52  ;;  %v229_v54 = vmul.f32 %v678_v52, %v678_v52 }
 0x23f   :  { %230 = vadd.xlane.f32.xlu1 %v229_v54 }
 0x2c4   :  { %v228_v9 = vpop.xlane.xlu1 %227 }
 0x2c5   :  { %v232_v10 = vmul.f32 0.015625, %v228_v9 }
 0x2c7   :  { %v234_v12 = vmul.f32 %v232_v10, %v232_v10  ;;  %v237_v18 = vsub.f32 %v678_v52, %v232_v10 }
 0x2c8   :  { %v231_v11 = vpop.xlane.xlu1 %230 }
 0x2c9   :  { %v233_v13 = vmul.f32 0.015625, %v231_v11 }
 0x2cb   :  { %v235_v14 = vsub.f32 %v233_v13, %v234_v12 }
 0x2cd   :  { %v236_v15 = vmax.f32 %v235_v14, 0.0 }
 0x2cf   :  { %v238_v16 = vadd.f32 1e-05, %v236_v15 }
 0x2d1   :  { %488 = vrsqrt.f32 %v238_v16 }
 0x2de   :  { %v489_v19 = vpop.eup %488 }
 0x2df   :  { %v240_v20 = vmul.f32 %v489_v19, %v237_v18 }
 0x2e1   :  { %v245_v21 = vmul.f32 %v244_v17, %v240_v20 }
 0x2e3   :  { %v250_v22 = vadd.f32 %v249_v1, %v245_v21 }
 0x2e5   :  { %v251_v23 = vmax.f32 %v250_v22, 0.0 }
 0x2e7   :  { %481 = vmatmul.mubr.f32.vlgmr.msra.gmra.mxu0 %v251_v23 }
 0x3a7   :  { %v341_v25 = vpop.f32.mrf.mxu0 }
 0x3a8   :  { %v342_v26 = vadd.f32 %v362_v24, %v341_v25 }
 0x3a9   :  { %v482_v27 = vpop.f32.mrf.mxu0 }
 0x3aa   :  { %346 = vst.msk [vmem:[#allocation2] sm:$0xff] %vm345_vm2, %v342_v26 }
 0x3ab   :  { %501 = shalt.err (!%p498_p4)
}
 0x3ac   :  { %356 = dma.vmem_to_hbm [thread:$0]  %s354_s22, 128, %s766_s7, [#allocation3]  }
 0x3ad   :  { %510 = dma.done.wait [#allocation3], 128  }
 0x3ae   :  { %511 = vsyncadd [#allocation3], 4294967168 }
 0x3af   :  { %360 = vsyncpa [#allocation3], 1 }

</bundles_post_ra>
